<compile_context>
chip_gen: v5e
topology: v5e:2x2
jax: 0.10.0
libtpu: 0.0.40
codegen_flags: <defaults>
</compile_context>

<pallas_src>
import functools

import jax
import jax.numpy as jnp
from jax.experimental import pallas as pl
from jax.experimental.pallas import tpu as pltpu

LEAKY_SLOPE = 0.2


def _leaky_relu(y):
    # For slope in (0, 1): max(y, slope*y) == LeakyReLU(y).
    return jnp.maximum(y, LEAKY_SLOPE * y)


def _adain_kernel_tpu(seed_ref, x_ref, w_ref, o_ref, *, noise_dtype):
    # seed_ref : SMEM (1,) int32   (scalar prefetch)
    # x_ref    : VMEM (tR, tT)
    # w_ref    : VMEM (tR, 1)      (per-row weight, broadcasts over lanes)
    # o_ref    : VMEM (tR, tT)
    r = pl.program_id(0)
    t = pl.program_id(1)
    # Hash (seed, row-tile, time-tile): the base seed is multiplied by a large
    # odd constant (int32 wraparound is a bijection), so consecutive layer
    # seeds (0, 1, 2, ...) map to far-apart streams and cannot collide with
    # the per-tile offsets; r/t get distinct odd multipliers.
    mixed = (seed_ref[0] * jnp.int32(1566083941)
             + (r + jnp.int32(1)) * jnp.int32(97787)
             + (t + jnp.int32(1)) * jnp.int32(362437))
    pltpu.prng_seed(mixed ^ jnp.int32(668265261))

    x = x_ref[...]
    w = w_ref[...]
    noise = pltpu.stateful_normal(x.shape, noise_dtype)
    if noise_dtype == x.dtype:
        scaled = noise * w
    else:
        # bf16 gaussian + bf16 scale (cheap EUP/VPU on v6e/v7x); upcast only
        # for the add + LeakyReLU which stay in x.dtype.
        # (bf16 rounding makes noise statistics differ negligibly from f32
        #  torch.randn_like -- acceptable for GAN noise injection.)
        scaled = (noise * w.astype(noise_dtype)).astype(x.dtype)
    y = x + scaled
    o_ref[...] = _leaky_relu(y)


def _adain_kernel_fallback(x_ref, n_ref, w_ref, o_ref):
    # Non-TPU path: noise precomputed in the wrapper (same math, same tiling).
    y = x_ref[...] + n_ref[...] * w_ref[...]
    o_ref[...] = _leaky_relu(y)


def _chip_kind():
    try:
        return jax.devices()[0].device_kind.lower()
    except Exception:
        return ""


def adain_forward(x, weight, *, seed=0, noise_key=None):
    """x: (N, C, T) float32, weight: (C,) float32."""
    N, C, T = x.shape
    R = N * C

    kind = _chip_kind()
    is_v5 = "v5" in kind
    is_v6 = "v6" in kind
    is_v7 = "v7" in kind

    # Generation-aware tiling / VMEM budget:
    #   v7x    : 64 MiB VMEM, 3.2 TB/s HBM -> 2 MiB blocks, 24 MiB scoped.
    #   v5e/v6e: 128 MiB VMEM               -> 4 MiB blocks, 48 MiB scoped.
    if is_v7:
        row_tile, time_tile, vmem_limit = 256, 2048, 24 * 1024 * 1024
    else:
        row_tile, time_tile, vmem_limit = 512, 2048, 48 * 1024 * 1024

    # bf16 noise only where the VPU/EUP have native bf16 (v6e / v7x); f32 on
    # v5e (bf16 would be emulated) and on unknown chips (conservative).
    use_bf16_noise = (x.dtype == jnp.float32) and (is_v6 or is_v7) and not is_v5
    noise_dtype = jnp.bfloat16 if use_bf16_noise else x.dtype

    x2 = x.reshape(R, T)
    # Per-row weight: row index is n*C + c  ->  weight[c].
    w_rows = jnp.tile(weight.astype(x.dtype), N).reshape(R, 1)

    # Lane-dense output: pad T up to a multiple of 128, slice padding off
    # after the kernel (avoids masked vst.msk partial stores on small T).
    Tp = 128 * pl.cdiv(T, 128)
    if Tp != T:
        x2 = jnp.pad(x2, ((0, 0), (0, Tp - T)))

    # Tile sizes: full dim if small, otherwise (8, 128)-aligned tiles.
    tR = R if R <= row_tile else row_tile          # row_tile is a multiple of 8
    tT = Tp if Tp <= time_tile else time_tile      # both multiples of 128
    grid = (pl.cdiv(R, tR), pl.cdiv(Tp, tT))

    # v7x has 2 TensorCores: make sure a "parallel" axis has >= 2 grid steps
    # so one core isn't idle on small/medium shapes.
    if is_v7 and grid[0] * grid[1] == 1:
        if Tp >= 256:
            tT = 128 * ((Tp // 128 + 1) // 2)       # ~half, 128-aligned
        elif R >= 16:
            tR = 8 * ((pl.cdiv(R, 8) + 1) // 2)     # ~half, 8-aligned
        grid = (pl.cdiv(R, tR), pl.cdiv(Tp, tT))

    compiler_params = pltpu.CompilerParams(
        dimension_semantics=("parallel", "parallel"),
        vmem_limit_bytes=vmem_limit,
    )
    out_shape = jax.ShapeDtypeStruct((R, Tp), x.dtype)

    if jax.default_backend() == "tpu":
        seed_arr = jnp.array([seed], dtype=jnp.int32)
        kernel = functools.partial(_adain_kernel_tpu, noise_dtype=noise_dtype)
        out2 = pl.pallas_call(
            kernel,
            out_shape=out_shape,
            grid_spec=pltpu.PrefetchScalarGridSpec(
                num_scalar_prefetch=1,
                grid=grid,
                in_specs=[
                    pl.BlockSpec((tR, tT), lambda r, t, s: (r, t)),
                    pl.BlockSpec((tR, 1), lambda r, t, s: (r, 0)),
                ],
                out_specs=pl.BlockSpec((tR, tT), lambda r, t, s: (r, t)),
            ),
            compiler_params=compiler_params,
        )(seed_arr, x2, w_rows)
    else:
        # TODO(synk): TPU stateful PRNG has no CPU/interpret lowering; draw the
        # gaussian noise with jax.random and stream it through the same tiling.
        if noise_key is None:
            noise_key = jax.random.PRNGKey(seed)
        noise = jax.random.normal(noise_key, (R, Tp), dtype=x.dtype)
        out2 = pl.pallas_call(
            _adain_kernel_fallback,
            out_shape=out_shape,
            grid_spec=pltpu.PrefetchScalarGridSpec(
                num_scalar_prefetch=0,
                grid=grid,
                in_specs=[
                    pl.BlockSpec((tR, tT), lambda r, t: (r, t)),
                    pl.BlockSpec((tR, tT), lambda r, t: (r, t)),
                    pl.BlockSpec((tR, 1), lambda r, t: (r, 0)),
                ],
                out_specs=pl.BlockSpec((tR, tT), lambda r, t: (r, t)),
            ),
            compiler_params=compiler_params,
        )(x2, noise, w_rows)

    if Tp != T:
        out2 = out2[:, :T]
    return out2.reshape(N, C, T)


if __name__ == "__main__":
    # Deterministic small example consistent with the module: (batch, channels, time).
    N, C, T = 2, 4, 16
    weight = jnp.ones((C,), dtype=jnp.float32)  # nn.Parameter(torch.ones(channels))

    key = jax.random.PRNGKey(0)
    x = jax.random.normal(key, (N, C, T), dtype=jnp.float32)

    out = adain_forward(x, weight, seed=0)
    out = jax.block_until_ready(out)

    # Sanity: shape/dtype preserved, finite values.
    assert out.shape == (N, C, T)
    assert out.dtype == jnp.float32
    assert bool(jnp.all(jnp.isfinite(out)))

    print("KERNEL_OK")
</pallas_src>

<mosaic_0001>
module attributes {stable_mosaic.version = 11 : i64} {
  func.func @_adain_kernel_fallback(%arg0: i32, %arg1: i32, %arg2: memref<8x128xf32, #tpu.memory_space<vmem>>, %arg3: memref<8x128xf32, #tpu.memory_space<vmem>>, %arg4: memref<8x1xf32, #tpu.memory_space<vmem>>, %arg5: memref<8x128xf32, #tpu.memory_space<vmem>>) attributes {dimension_semantics = [#tpu.dimension_semantics<parallel>, #tpu.dimension_semantics<parallel>], iteration_bounds = array<i64: 1, 1>, scalar_prefetch = 0 : i64, scratch_operands = 0 : i64, tpu.core_type = #tpu.core_type<tc>, window_params = [{transform_indices = @transform_0, window_bounds = array<i64: 8, 128>}, {transform_indices = @transform_1, window_bounds = array<i64: 8, 128>}, {transform_indices = @transform_2, window_bounds = array<i64: 8, 1>}, {transform_indices = @transform_3, window_bounds = array<i64: 8, 128>}]} {
    %c0 = arith.constant 0 : index
    %c0_0 = arith.constant 0 : index
    %0 = vector.load %arg2[%c0, %c0_0] : memref<8x128xf32, #tpu.memory_space<vmem>>, vector<8x128xf32>
    %c0_1 = arith.constant 0 : index
    %c0_2 = arith.constant 0 : index
    %1 = vector.load %arg3[%c0_1, %c0_2] : memref<8x128xf32, #tpu.memory_space<vmem>>, vector<8x128xf32>
    %c0_3 = arith.constant 0 : index
    %c0_4 = arith.constant 0 : index
    %2 = vector.load %arg4[%c0_3, %c0_4] : memref<8x1xf32, #tpu.memory_space<vmem>>, vector<8x1xf32>
    %3 = vector.broadcast %2 : vector<8x1xf32> to vector<8x128xf32>
    %4 = arith.mulf %1, %3 : vector<8x128xf32>
    %5 = arith.addf %0, %4 : vector<8x128xf32>
    %cst = arith.constant 2.000000e-01 : f32
    %6 = vector.broadcast %cst : f32 to vector<8x128xf32>
    %7 = arith.mulf %6, %5 : vector<8x128xf32>
    %8 = arith.maximumf %5, %7 : vector<8x128xf32>
    %c0_5 = arith.constant 0 : index
    %c0_6 = arith.constant 0 : index
    %9 = vector.load %arg5[%c0_5, %c0_6] : memref<8x128xf32, #tpu.memory_space<vmem>>, vector<8x128xf32>
    tpu.vector_store %arg5[%c0_5, %c0_6], %8 {strides = array<i32>} : memref<8x128xf32, #tpu.memory_space<vmem>>, vector<8x128xf32>,
    return
  }
  func.func @transform_0(%arg0: i32, %arg1: i32) -> (i32, i32) {
    %c0_i32 = arith.constant 0 : i32
    return %arg0, %arg1 : i32, i32
  }
  func.func @transform_1(%arg0: i32, %arg1: i32) -> (i32, i32) {
    %c0_i32 = arith.constant 0 : i32
    return %arg0, %arg1 : i32, i32
  }
  func.func @transform_2(%arg0: i32, %arg1: i32) -> (i32, i32) {
    %c0_i32 = arith.constant 0 : i32
    %c0_i32_0 = arith.constant 0 : i32
    return %arg0, %c0_i32 : i32, i32
  }
  func.func @transform_3(%arg0: i32, %arg1: i32) -> (i32, i32) {
    %c0_i32 = arith.constant 0 : i32
    return %arg0, %arg1 : i32, i32
  }
}

</mosaic_0001>

<bundles_post_ra>
// kernel: tpu_custom_call.1
= control target key start
LH: loop header
LB: loop body
LE: loop exit
PB: predicated region body
PF: predicated region fallthrough
CT: control target
= control target key end

     0   :  { %8 = vsyncpa [#allocation3], 0  ;;  %s150_s0 = inlined_call_operand.vmem [shape: f32[8,128], index: 0, kind: input, shape index: {}]   ;;  %s151_s1 = inlined_call_operand.hbm [shape: f32[8,128], index: 1, kind: input, shape index: {}]   ;;  %s152_s2 = inlined_call_operand.vmem [shape: f32[8,1], index: 2, kind: input, shape index: {}]   ;;  %s153_s3 = inlined_call_operand.hbm [shape: f32[8,128], index: 3, kind: output, shape index: {}]  }
   0x1   :  { %9 = vsyncpa [#allocation4], 0  ;;  %s17_s14 = sshll.u32 %s151_s1, 4  ;;  %s115_s15 = smov [#allocation2]   ;;  %s18_s14 = int_to_ptr.hbm [resolvable:$true] %s17_s14 }
   0x2   :  { %s19_s16 = sshll.u32 %s115_s15, 4  ;;  %s20_s16 = int_to_ptr.vmem [resolvable:$true] %s19_s16 }
   0x3   :  { %22 = dma.hbm_to_vmem [thread:$0]  %s18_s14, 128, %s20_s16, [#allocation3]  }
   0x4   :  { %111 = dma.done.wait [#allocation3], 128  }
   0x5   :  { %112 = vsyncadd [#allocation3], 4294967168  ;;  %v116_v0 = vmov 0   ;;  %v31_v1 = vld [vmem:[%s152_s2] sm:$0xff]  ;;  %s117_s1 = smov [#allocation5]   ;;  %s49_s24 = sshll.u32 %s153_s3, 4  ;;  %s50_s24 = int_to_ptr.hbm [resolvable:$true] %s49_s24 }
   0x6   :  { %62 = vset.pattern.permute.xlu0 %v116_v0  ;;  %v30_v2 = vld [vmem:[#allocation2] sm:$0xff]  ;;  %s47_s21 = sshll.u32 %s117_s1, 4  ;;  %s48_s21 = int_to_ptr.vmem [resolvable:$true] %s47_s21 }
   0x7   :  { %34 = vperm.xlu0 %62, %v31_v1   ;;  %v29_v4 = vld [vmem:[%s150_s0] sm:$0xff] }
  0x79   :  { %v35_v3 = vpop.permute.xlu0 %34 }
  0x7a   :  { %v37_v5 = vmul.f32 %v35_v3, %v30_v2 }
  0x7c   :  { %v38_v6 = vadd.f32 %v37_v5, %v29_v4 }
  0x7e   :  { %v39_v7 = vmul.f32 0.2, %v38_v6 }
  0x80   :  { %v40_v8 = vmax.f32 %v38_v6, %v39_v7 }
  0x82   :  { %41 = vst [vmem:[#allocation5] sm:$0xff] %v40_v8 }
  0x83   :  { %52 = dma.vmem_to_hbm [thread:$0]  %s48_s21, 128, %s50_s24, [#allocation4]  }
  0x84   :  { %113 = dma.done.wait [#allocation4], 128  }
  0x85   :  { %114 = vsyncadd [#allocation4], 4294967168 }
  0x86   :  { %57 = vsyncpa [#allocation3], 1 }
  0x87   :  { %58 = vsyncpa [#allocation4], 1 }

</bundles_post_ra>
